<compile_context>
chip_gen: v5e
topology: v5e:2x2
jax: 0.10.0
libtpu: 0.0.40
codegen_flags: <defaults>
</compile_context>

<pallas_src>
import functools

import jax
import jax.numpy as jnp
from jax import lax
from jax.experimental import pallas as pl
from jax.experimental.pallas import tpu as pltpu


# --------------------------------------------------------------------------- #
# Gather path: table stays in HBM, manual row DMAs through a VMEM ring buffer #
# --------------------------------------------------------------------------- #
def _gather_kernel(ids_ref, idf_ref, w_hbm, out_ref, row_buf, sem,
                   *, seq_len, nbuf, vocab):
    """One grid step == one document.
    ids_ref: SMEM (B, S) int32 (whole array)
    idf_ref: VMEM (1, 1, S) f32 (this document's idf row)
    w_hbm:   HBM  (V, D) embedding table (untouched, any float dtype)
    out_ref: VMEM (1, 1, D) f32
    row_buf: VMEM (nbuf, 1, D) DMA ring buffer (table dtype)
    sem:     DMA semaphores (nbuf,)
    """
    b = pl.program_id(0)

    def token_id(j):
        # Clamp out-of-range ids (PyTorch would raise; keep DMA addresses in range).
        return jnp.clip(ids_ref[b, j], 0, vocab - 1)

    def start_fetch(j, slot):
        pltpu.make_async_copy(
            w_hbm.at[pl.ds(token_id(j), 1), :], row_buf.at[slot], sem.at[slot]
        ).start()

    def wait_fetch(slot):
        pltpu.make_async_copy(
            w_hbm.at[pl.ds(0, 1), :], row_buf.at[slot], sem.at[slot]
        ).wait()

    # Prime the ring with up to nbuf-1 outstanding row fetches (static unroll).
    for j in range(min(nbuf - 1, seq_len)):
        start_fetch(j, j)

    def body(j, acc):
        # Prefetch token j+nbuf-1 into the slot freed last iteration BEFORE the
        # wait: scalar id reads stay ahead of the DMA wait (sst->sld forwarding)
        # and DMA issue stays off the critical path.
        @pl.when(j + (nbuf - 1) < seq_len)
        def _():
            start_fetch(j + nbuf - 1, (j + nbuf - 1) % nbuf)

        slot = j % nbuf
        wait_fetch(slot)
        # Register accumulation: (1, D) f32 carry, no VMEM read-modify-write.
        return acc + row_buf[slot].astype(jnp.float32)

    acc = lax.fori_loop(0, seq_len, body,
                        jnp.zeros((1, row_buf.shape[-1]), jnp.float32))

    sum_idf = jnp.sum(idf_ref[...].astype(jnp.float32))
    out_ref[...] = (sum_idf * acc).reshape(out_ref.shape).astype(out_ref.dtype)


def _gather_call(ids, idf, weights, *, nbuf):
    B, S = ids.shape
    V, D = weights.shape
    nbuf = max(2, min(nbuf, S + 1))            # ring depth (nbuf-1 fetches in flight)
    kernel = functools.partial(_gather_kernel, seq_len=S, nbuf=nbuf, vocab=V)

    out = pl.pallas_call(
        kernel,
        out_shape=jax.ShapeDtypeStruct((B, 1, D), jnp.float32),
        grid=(B,),
        in_specs=[
            pl.BlockSpec(memory_space=pltpu.MemorySpace.SMEM),   # token ids (whole)
            pl.BlockSpec((1, 1, S), lambda b: (b, 0, 0)),        # this doc's idf row
            pl.BlockSpec(memory_space=pl.ANY),                   # table stays in HBM
        ],
        out_specs=pl.BlockSpec((1, 1, D), lambda b: (b, 0, 0)),
        scratch_shapes=[
            pltpu.VMEM((nbuf, 1, D), weights.dtype),             # DMA ring buffer
            pltpu.SemaphoreType.DMA((nbuf,)),
        ],
        compiler_params=pltpu.CompilerParams(
            dimension_semantics=("parallel",)),                  # v7x: split B on 2 TCs
    )(ids, idf.reshape(B, 1, S), weights)
    return out.reshape(B, D)


# --------------------------------------------------------------------------- #
# Resident fast path: whole table in VMEM, counts(B,V) @ W(V,D) on the MXU    #
# --------------------------------------------------------------------------- #
def _resident_kernel(ids_ref, idf_ref, w_ref, out_ref, *, vocab):
    ids = jnp.clip(ids_ref[...], 0, vocab - 1)                       # (B, S) int32
    bsz, seq = ids.shape
    one_hot = (ids[:, :, None] ==
               lax.broadcasted_iota(jnp.int32, (bsz, seq, vocab), 2))
    counts = jnp.sum(one_hot.astype(jnp.float32), axis=1)            # (B, V)
    row_sums = jnp.dot(counts, w_ref[...].astype(jnp.float32),
                       preferred_element_type=jnp.float32)           # (B, D) on MXU
    sum_idf = jnp.sum(idf_ref[...], axis=1, keepdims=True)           # (B, 1)
    out_ref[...] = (sum_idf * row_sums).astype(out_ref.dtype)


def _vmem_capacity_bytes():
    # Generation-aware VMEM budget (v5e/v6e: 128 MiB, v7x: 64 MiB per core).
    try:
        return int(getattr(pltpu.get_tpu_info(), "vmem_capacity_bytes", 64 << 20))
    except Exception:
        return 64 << 20


def _resident_call(ids, idf, weights):
    B, S = ids.shape
    V, D = weights.shape
    vmem_cap = _vmem_capacity_bytes()
    return pl.pallas_call(
        functools.partial(_resident_kernel, vocab=V),
        out_shape=jax.ShapeDtypeStruct((B, D), jnp.float32),
        in_specs=[
            pl.BlockSpec(memory_space=pltpu.MemorySpace.VMEM),       # ids
            pl.BlockSpec(memory_space=pltpu.MemorySpace.VMEM),       # idf
            pl.BlockSpec(memory_space=pltpu.MemorySpace.VMEM),       # table resident
        ],
        out_specs=pl.BlockSpec(memory_space=pltpu.MemorySpace.VMEM),
        compiler_params=pltpu.CompilerParams(
            vmem_limit_bytes=min(vmem_cap // 2, 96 << 20)),
    )(ids, idf, weights)


# --------------------------------------------------------------------------- #
# Wrapper with size dispatch                                                  #
# --------------------------------------------------------------------------- #
def weighted_doc_embedding(inputs, idf, weights, *, nbuf=16, force_path=None):
    """inputs: (B, S) int ids; idf: (B, S) float; weights: (V, D) float -> (B, D) f32."""
    B, S = inputs.shape
    V, D = weights.shape
    ids = inputs.astype(jnp.int32)
    idf_f = idf.astype(jnp.float32)

    path = force_path
    if path is None:
        budget = _vmem_capacity_bytes() // 4
        itemsize = jnp.dtype(weights.dtype).itemsize
        resident_bytes = (V * D * (itemsize + 4)        # table + f32 cast for the dot
                          + B * S * V * 4               # in-kernel one-hot
                          + B * (V + D + S) * 4)        # counts / out / idf
        path = "resident" if resident_bytes <= budget else "gather"

    if path == "resident":
        return _resident_call(ids, idf_f, weights)
    return _gather_call(ids, idf_f, weights, nbuf=nbuf)


if __name__ == "__main__":
    B, S, V, D = 2, 8, 128, 32

    key = jax.random.PRNGKey(0)
    k_w, k_ids, k_idf = jax.random.split(key, 3)

    # Deterministic "pretrained" embedding table (frozen weights in the module).
    weights = jax.random.normal(k_w, (V, D), dtype=jnp.float32)
    inputs = jax.random.randint(k_ids, (B, S), 0, V, dtype=jnp.int32)
    idf = jax.random.uniform(k_idf, (B, S), dtype=jnp.float32)

    # Pure-JAX reference of the PyTorch forward.
    emb = weights[inputs]                                # (B, S, D)
    sum_idf = jnp.sum(idf, axis=1).reshape(B, 1, 1)      # (B, 1, 1)
    ref = jnp.sum(sum_idf * emb, axis=1)                 # (B, D)

    # Auto-dispatch (resident MXU fast path for this tiny table) ...
    out_auto = jax.block_until_ready(weighted_doc_embedding(inputs, idf, weights))
    # ... and the large-vocab HBM-gather path, exercised explicitly.
    out_gather = jax.block_until_ready(
        weighted_doc_embedding(inputs, idf, weights, force_path="gather"))

    assert out_auto.shape == (B, D) and out_gather.shape == (B, D)
    assert jnp.allclose(out_auto, ref, atol=1e-4, rtol=1e-4)
    assert jnp.allclose(out_gather, ref, atol=1e-4, rtol=1e-4)
    print("KERNEL_OK")
</pallas_src>

<mosaic_0001>
module attributes {stable_mosaic.version = 11 : i64} {
  func.func @_resident_kernel(%arg0: memref<2x8xi32, #tpu.memory_space<vmem>>, %arg1: memref<2x8xf32, #tpu.memory_space<vmem>>, %arg2: memref<128x32xf32, #tpu.memory_space<vmem>>, %arg3: memref<2x32xf32, #tpu.memory_space<vmem>>) attributes {dimension_semantics = [], scalar_prefetch = 0 : i64, scratch_operands = 0 : i64, tpu.core_type = #tpu.core_type<tc>} {
    %c0 = arith.constant 0 : index
    %c0_0 = arith.constant 0 : index
    %0 = vector.load %arg0[%c0, %c0_0] : memref<2x8xi32, #tpu.memory_space<vmem>>, vector<2x8xi32>
    %c0_i32 = arith.constant 0 : i32
    %c127_i32 = arith.constant 127 : i32
    %1 = vector.broadcast %c0_i32 : i32 to vector<2x8xi32>
    %2 = arith.maxsi %1, %0 : vector<2x8xi32>
    %3 = vector.broadcast %c127_i32 : i32 to vector<2x8xi32>
    %4 = arith.minsi %3, %2 : vector<2x8xi32>
    %5 = vector.shape_cast %4 : vector<2x8xi32> to vector<2x8x1xi32>
    %6 = tpu.iota {dimensions = array<i32: 2>} : vector<2x8x128xi32>
    %7 = vector.broadcast %5 : vector<2x8x1xi32> to vector<2x8x128xi32>
    %8 = arith.cmpi eq, %7, %6 : vector<2x8x128xi32>
    %9 = arith.extui %8 : vector<2x8x128xi1> to vector<2x8x128xi32>
    %10 = arith.sitofp %9 : vector<2x8x128xi32> to vector<2x8x128xf32>
    %cst = arith.constant dense<0.000000e+00> : vector<2x128xf32>
    %11 = vector.multi_reduction <add>, %10, %cst [1] : vector<2x8x128xf32> to vector<2x128xf32>
    %c0_1 = arith.constant 0 : index
    %c0_2 = arith.constant 0 : index
    %12 = vector.load %arg2[%c0_1, %c0_2] : memref<128x32xf32, #tpu.memory_space<vmem>>, vector<128x32xf32>
    %cst_3 = arith.constant dense<0.000000e+00> : vector<2x32xf32>
    %13 = tpu.matmul %11, %12, %cst_3 {dimension_numbers = #tpu.dot_dimension_numbers<[1], [0], [0], [1], [0, 0, 1, 1], [], []>} : vector<2x128xf32>, vector<128x32xf32>, vector<2x32xf32> -> vector<2x32xf32>
    %c0_4 = arith.constant 0 : index
    %c0_5 = arith.constant 0 : index
    %14 = vector.load %arg1[%c0_4, %c0_5] : memref<2x8xf32, #tpu.memory_space<vmem>>, vector<2x8xf32>
    %cst_6 = arith.constant dense<0.000000e+00> : vector<2xf32>
    %15 = vector.multi_reduction <add>, %14, %cst_6 [1] : vector<2x8xf32> to vector<2xf32>
    %16 = vector.shape_cast %15 : vector<2xf32> to vector<2x1xf32>
    %17 = vector.broadcast %16 : vector<2x1xf32> to vector<2x32xf32>
    %18 = arith.mulf %17, %13 : vector<2x32xf32>
    %c0_7 = arith.constant 0 : index
    %c0_8 = arith.constant 0 : index
    %19 = vector.load %arg3[%c0_7, %c0_8] : memref<2x32xf32, #tpu.memory_space<vmem>>, vector<2x32xf32>
    tpu.vector_store %arg3[%c0_7, %c0_8], %18 {strides = array<i32>} : memref<2x32xf32, #tpu.memory_space<vmem>>, vector<2x32xf32>,
    return
  }
}

</mosaic_0001>

<bundles_post_ra>
// kernel: tpu_custom_call.1
= control target key start
LH: loop header
LB: loop body
LE: loop exit
PB: predicated region body
PF: predicated region fallthrough
CT: control target
= control target key end

     0   :  { %v21_v0 = vlaneseq  ;;  %s229_s0 = inlined_call_operand.vmem [shape: s32[2,8], index: 0, kind: input, shape index: {}]   ;;  %s230_s1 = inlined_call_operand.vmem [shape: f32[2,8], index: 1, kind: input, shape index: {}]   ;;  %s231_s2 = inlined_call_operand.vmem [shape: f32[128,32], index: 2, kind: input, shape index: {}]   ;;  %s232_s3 = inlined_call_operand.hbm [shape: f32[2,32], index: 3, kind: output, shape index: {}]  }
   0x1   :  { %v15_v1 = vld [vmem:[%s229_s0] sm:$0x3]  ;;  %v69_v2 = vld [vmem:[%s231_s2 + $0x78] sm:$0xff]  ;;  %v68_v3 = vld [vmem:[%s231_s2 + $0x70] sm:$0xff] }
   0x2   :  { %vm16_vm0 = vcmp.gt.s32.totalorder %v15_v1, 0  ;;  %75 = vmatpush.msra.mxu0 %v69_v2 }
   0x3   :  { %8 = vsyncpa [#allocation3], 0  ;;  %v22_v4 = vshrl.u32 %v21_v0, 7  ;;  %v17_v5 = vsel %vm16_vm0, %v15_v1, 0  ;;  %v67_v6 = vld [vmem:[%s231_s2 + $0x68] sm:$0xff]  ;;  %v66_v7 = vld [vmem:[%s231_s2 + $0x60] sm:$0xff] }
   0x4   :  { %vm18_vm1 = vcmp.lt.s32.totalorder %v17_v5, 127  ;;  %76 = vmatpush.msra.mxu0 %v68_v3  ;;  %v65_v11 = vld [vmem:[%s231_s2 + $0x58] sm:$0xff]  ;;  %v64_v12 = vld [vmem:[%s231_s2 + $0x50] sm:$0xff]  ;;  %v63_v13 = vld [vmem:[%s231_s2 + $0x48] sm:$0xff]  ;;  %vm96_vm2 = vcmask 58368   ;;  %v35_v25 = vand.u32 127, %v21_v0 }
   0x5   :  { %123 = vset.pattern.permute.xlu0 %v22_v4  ;;  %v19_v8 = vsel %vm18_vm1, %v17_v5, 127  ;;  %v62_v14 = vld [vmem:[%s231_s2 + $0x40] sm:$0xff]  ;;  %v61_v15 = vld [vmem:[%s231_s2 + $0x38] sm:$0xff]  ;;  %v60_v16 = vld [vmem:[%s231_s2 + $0x30] sm:$0xff]  ;;  %v150_v27 = vmov 0.0   ;;  %vm72_vm5 = vcmask 1041409  }
   0x6   :  { %77 = vmatpush.msra.mxu0 %v67_v6  ;;  %v20_v9 = vperm.slane %v19_v8, 0  ;;  %v27_v10 = vperm.slane %v19_v8, 1  ;;  %v59_v17 = vld [vmem:[%s231_s2 + $0x28] sm:$0xff]  ;;  %v58_v18 = vld [vmem:[%s231_s2 + $0x20] sm:$0xff]  ;;  %v57_v19 = vld [vmem:[%s231_s2 + $0x18] sm:$0xff]  ;;  %s110_s21 = sshll.u32 %s232_s3, 4  ;;  %s111_s21 = int_to_ptr.hbm [resolvable:$true] %s110_s21 }
   0x7   :  { %v56_v20 = vld [vmem:[%s231_s2 + $0x10] sm:$0xff]  ;;  %v55_v21 = vld [vmem:[%s231_s2 + $0x8] sm:$0xff]  ;;  %v54_v22 = vld [vmem:[%s231_s2] sm:$0xff]  ;;  %vm101_vm6 = vcmask 254976  }
   0x8   :  { %78 = vmatpush.msra.mxu0 %v66_v7  ;;  %v95_v23 = vld [vmem:[%s230_s1] sm:$0x3]  ;;  %s151_s1 = smov [#allocation2]  }
   0x9   :  { %v97_v24 = vsel %vm96_vm2, %v95_v23, 0.0  ;;  %s108_s2 = sshll.u32 %s151_s1, 4  ;;  %s109_s2 = int_to_ptr.vmem [resolvable:$true] %s108_s2 }
   0xa   :  { %79 = vmatpush.msra.mxu0 %v65_v11  ;;  %98 = vadd.xlane.f32.xlu1 %v97_v24 }
   0xc   :  { %80 = vmatpush.msra.mxu0 %v64_v12 }
   0xd   :  { %25 = vperm.xlu0 %123, %v20_v9  }
   0xe   :  { %81 = vmatpush.msra.mxu0 %v63_v13 }
  0x10   :  { %82 = vmatpush.msra.mxu0 %v62_v14 }
  0x12   :  { %83 = vmatpush.msra.mxu0 %v61_v15 }
  0x14   :  { %84 = vmatpush.msra.mxu0 %v60_v16 }
  0x15   :  { %32 = vperm.xlu0 %123, %v27_v10  }
  0x16   :  { %85 = vmatpush.msra.mxu0 %v59_v17 }
  0x18   :  { %86 = vmatpush.msra.mxu0 %v58_v18 }
  0x1a   :  { %87 = vmatpush.msra.mxu0 %v57_v19 }
  0x1c   :  { %88 = vmatpush.msra.mxu0 %v56_v20 }
  0x1e   :  { %89 = vmatpush.msra.mxu0 %v55_v21 }
  0x20   :  { %90 = vmatpush.msra.mxu0 %v54_v22 }
  0x7d   :  { %v99_v44 = vpop.xlane.xlu1 %98 }
  0x7f   :  { %v26_v26 = vpop.permute.xlu0 %25 }
  0x80   :  { %vm36_vm3 = vcmp.eq.s32.totalorder %v26_v26, %v35_v25 }
  0x81   :  { %v119_v28 = vsel %vm36_vm3, 1.0, %v150_v27 }
  0x82   :  { %v42_v29 = vrot.slane %v119_v28, 4 }
  0x84   :  { %v43_v30 = vadd.f32 %v119_v28, %v42_v29 }
  0x86   :  { %v44_v32 = vrot.slane %v43_v30, 2 }
  0x87   :  { %v33_v31 = vpop.permute.xlu0 %32 }
  0x88   :  { %vm37_vm4 = vcmp.eq.s32.totalorder %v33_v31, %v35_v25  ;;  %v45_v35 = vadd.f32 %v44_v32, %v43_v30 }
  0x89   :  { %v120_v33 = vsel %vm37_vm4, 1.0, %v150_v27 }
  0x8a   :  { %v48_v34 = vrot.slane %v120_v33, 4  ;;  %v46_v38 = vrot.slane %v45_v35, 1 }
  0x8c   :  { %v49_v36 = vadd.f32 %v120_v33, %v48_v34  ;;  %v47_v41 = vadd.f32 %v46_v38, %v45_v35 }
  0x8e   :  { %v50_v37 = vrot.slane %v49_v36, 2 }
  0x90   :  { %v51_v39 = vadd.f32 %v50_v37, %v49_v36 }
  0x92   :  { %v52_v40 = vrot.slane %v51_v39, 1 }
  0x94   :  { %v53_v42 = vadd.f32 %v52_v40, %v51_v39 }
  0x96   :  { %v73_v43 = vsel %vm72_vm5, %v53_v42, %v47_v41 }
  0x97   :  { %91 = vmatmul.f32.vlgmr.msra.gmra.mxu0 %v73_v43 }
 0x114   :  { %v92_v45 = vpop.f32.mrf.mxu0 }
 0x115   :  { %v100_v46 = vmul.f32 %v99_v44, %v92_v45 }
 0x117   :  { %102 = vst.msk [vmem:[#allocation2] sm:$0x3] %vm101_vm6, %v100_v46 }
 0x118   :  { %113 = dma.vmem_to_hbm [thread:$0]  %s109_s2, 32, %s111_s21, [#allocation3]  }
 0x119   :  { %148 = dma.done.wait [#allocation3], 32  }
 0x11a   :  { %149 = vsyncadd [#allocation3], 4294967264 }
 0x11b   :  { %118 = vsyncpa [#allocation3], 1 }

</bundles_post_ra>
